<compile_context>
chip_gen: v7x
topology: tpu7x:2x2x1
jax: 0.10.0
libtpu: 0.0.40
codegen_flags: <defaults>
</compile_context>

<pallas_src>
import functools

import jax
import jax.numpy as jnp
from jax import lax
from jax.experimental import pallas as pl
from jax.experimental.pallas import tpu as pltpu

_LANES = 128
_MAX_BLOCK_ROWS = 1024  # (1024, 128) f32 tile = 512 KiB


def _round_up(x, m):
    return (x + m - 1) // m * m


def _pick_block_rows(n_elems):
    rows_needed = pl.cdiv(n_elems, _LANES)
    return min(_MAX_BLOCK_ROWS, _round_up(rows_needed, 8))


def _to_slab(x, block_rows):
    """Flatten x and zero-pad/reshape into a lane-dense (T*block_rows, 128) slab."""
    flat = jnp.ravel(x)
    n = flat.size
    rows = _round_up(pl.cdiv(n, _LANES), block_rows)
    padded = rows * _LANES
    if padded != n:
        flat = jnp.pad(flat, (0, padded - n))
    return flat.reshape(rows, _LANES)


# ----------------------------- reduction kernels -----------------------------

def _bce_sum_kernel(x_ref, y_ref, out_ref, *, block_rows, valid_elems):
    """Accumulate sum of BCE-with-logits over lane-dense tiles into a (1,1) output."""
    i = pl.program_id(0)
    x = x_ref[...].astype(jnp.float32)
    y = y_ref[...].astype(jnp.float32)
    # numerically stable BCE-with-logits: max(x,0) - x*y + log1p(exp(-|x|))
    # (log1p/exp land on the EUP slot; kernel is memory bound, so leave as-is)
    bce = jnp.maximum(x, 0.0) - x * y + jnp.log1p(jnp.exp(-jnp.abs(x)))
    if valid_elems is not None:
        # Mask the zero-padded tail; padding is NOT neutral for BCE.
        r = lax.broadcasted_iota(jnp.int32, bce.shape, 0)
        c = lax.broadcasted_iota(jnp.int32, bce.shape, 1)
        gidx = (i * block_rows + r) * _LANES + c
        bce = jnp.where(gidx < valid_elems, bce, 0.0)

    @pl.when(i == 0)
    def _():
        out_ref[...] = jnp.zeros_like(out_ref)

    out_ref[...] += jnp.sum(bce)


def _sl1_sum_kernel(bp_ref, bt_ref, out_ref):
    """Accumulate sum of smooth-L1 (beta=1) over lane-dense tiles into a (1,1) output."""
    i = pl.program_id(0)
    d = bp_ref[...].astype(jnp.float32) - bt_ref[...].astype(jnp.float32)
    ad = jnp.abs(d)
    # Zero-padded tail: d = 0 -> contribution exactly 0, no mask needed.
    sl1 = jnp.where(ad < 1.0, 0.5 * d * d, ad - 0.5)

    @pl.when(i == 0)
    def _():
        out_ref[...] = jnp.zeros_like(out_ref)

    out_ref[...] += jnp.sum(sl1)


def _reduce_call(kernel, a_slab, b_slab, block_rows):
    n_tiles = a_slab.shape[0] // block_rows
    return pl.pallas_call(
        kernel,
        out_shape=jax.ShapeDtypeStruct((1, 1), jnp.float32),
        grid=(n_tiles,),
        in_specs=[
            pl.BlockSpec((block_rows, _LANES), lambda i: (i, 0)),
            pl.BlockSpec((block_rows, _LANES), lambda i: (i, 0)),
        ],
        out_specs=pl.BlockSpec((1, 1), lambda i: (0, 0)),  # resident accumulator
        compiler_params=pltpu.CompilerParams(
            dimension_semantics=("arbitrary",)),
    )(a_slab, b_slab)


# ----------------------------- broadcast kernel ------------------------------

def _combine_kernel(bce_ref, sl1_ref, y_ref, out_ref, *, c1, c2):
    y = y_ref[...].astype(jnp.float32)
    # (1,1) scalars broadcast against the lane-dense (block_rows, 128) tile.
    out = c1 * bce_ref[...] + y * (c2 * sl1_ref[...])
    out_ref[...] = out.astype(out_ref.dtype)


# --------------------------------- wrapper -----------------------------------

def multitask_loss(predictions, targets, *, n_cls, n_reg, lam):
    bbox_preds, class_preds = predictions
    bbox_truth, class_truth = targets

    cls_elems = class_truth.size
    box_elems = bbox_truth.size

    cls_blk = _pick_block_rows(cls_elems)
    box_blk = _pick_block_rows(box_elems)

    cp_slab = _to_slab(class_preds, cls_blk)
    ct_slab = _to_slab(class_truth, cls_blk)
    bp_slab = _to_slab(bbox_preds, box_blk)
    bt_slab = _to_slab(bbox_truth, box_blk)

    bce_kernel = functools.partial(
        _bce_sum_kernel,
        block_rows=cls_blk,
        valid_elems=None if cp_slab.size == cls_elems else cls_elems)

    bce_sum = _reduce_call(bce_kernel, cp_slab, ct_slab, cls_blk)       # (1,1) f32
    sl1_sum = _reduce_call(_sl1_sum_kernel, bp_slab, bt_slab, box_blk)  # (1,1) f32

    # Fold normalizations into trace-time constants (no in-kernel divides).
    c1 = 1.0 / (float(n_cls) * float(cls_elems))
    c2 = float(lam) / (float(n_reg) * float(box_elems))

    n_cls_tiles = ct_slab.shape[0] // cls_blk
    out_slab = pl.pallas_call(
        functools.partial(_combine_kernel, c1=c1, c2=c2),
        out_shape=jax.ShapeDtypeStruct(ct_slab.shape, class_truth.dtype),
        grid=(n_cls_tiles,),
        in_specs=[
            pl.BlockSpec((1, 1), lambda i: (0, 0)),
            pl.BlockSpec((1, 1), lambda i: (0, 0)),
            pl.BlockSpec((cls_blk, _LANES), lambda i: (i, 0)),
        ],
        out_specs=pl.BlockSpec((cls_blk, _LANES), lambda i: (i, 0)),
        compiler_params=pltpu.CompilerParams(
            dimension_semantics=("parallel",)),
    )(bce_sum, sl1_sum, ct_slab)

    # Undo the lane-dense padding/reshape (wrapper-side layout plumbing only).
    return out_slab.reshape(-1)[:cls_elems].reshape(class_truth.shape)


def _reference(predictions, targets, *, n_cls, n_reg, lam):
    """Pure-JAX reference mirroring the PyTorch forward."""
    bbox_preds, class_preds = predictions
    bbox_truth, class_truth = targets
    x = class_preds.astype(jnp.float32)
    y = class_truth.astype(jnp.float32)
    bce = jnp.mean(jnp.maximum(x, 0.0) - x * y + jnp.log1p(jnp.exp(-jnp.abs(x))))
    d = bbox_preds.astype(jnp.float32) - bbox_truth.astype(jnp.float32)
    ad = jnp.abs(d)
    sl1 = jnp.mean(jnp.where(ad < 1.0, 0.5 * d * d, ad - 0.5))
    return (1.0 / n_cls) * bce + (lam / n_reg) * (y * sl1)


if __name__ == "__main__":
    # MultiTaskLoss has no learnable parameters; n_cls / n_reg / l are scalar
    # hyper-parameters fixed here deterministically.
    n_cls, n_reg, lam = 4, 16, 1.0

    key = jax.random.PRNGKey(0)
    k1, k2, k3, k4 = jax.random.split(key, 4)

    N = 8                          # number of ROIs / anchors
    bbox_preds = jax.random.normal(k1, (N, n_reg), dtype=jnp.float32)
    bbox_truth = jax.random.normal(k2, (N, n_reg), dtype=jnp.float32)
    class_preds = jax.random.normal(k3, (N, n_cls), dtype=jnp.float32)
    class_truth = jax.random.bernoulli(k4, 0.5, (N, n_cls)).astype(jnp.float32)

    predictions = (bbox_preds, class_preds)
    targets = (bbox_truth, class_truth)

    out = multitask_loss(predictions, targets, n_cls=n_cls, n_reg=n_reg, lam=lam)
    out = jax.block_until_ready(out)

    ref = _reference(predictions, targets, n_cls=n_cls, n_reg=n_reg, lam=lam)
    assert out.shape == class_truth.shape
    assert jnp.allclose(out, ref, atol=1e-5, rtol=1e-5)

    print("KERNEL_OK")
</pallas_src>

<mosaic_0001>
module attributes {stable_mosaic.version = 11 : i64} {
  func.func @_bce_sum_kernel(%arg0: i32, %arg1: memref<8x128xf32, #tpu.memory_space<vmem>>, %arg2: memref<8x128xf32, #tpu.memory_space<vmem>>, %arg3: memref<1x1xf32, #tpu.memory_space<vmem>>) attributes {dimension_semantics = [#tpu.dimension_semantics<arbitrary>], iteration_bounds = array<i64: 1>, scalar_prefetch = 0 : i64, scratch_operands = 0 : i64, tpu.core_type = #tpu.core_type<tc>, window_params = [{transform_indices = @transform_0, window_bounds = array<i64: 8, 128>}, {transform_indices = @transform_1, window_bounds = array<i64: 8, 128>}, {pipeline_mode = #tpu.pipeline_mode<synchronous>, transform_indices = @transform_2, window_bounds = array<i64: 1, 1>}]} {
    %c0 = arith.constant 0 : index
    %c0_0 = arith.constant 0 : index
    %0 = vector.load %arg1[%c0, %c0_0] : memref<8x128xf32, #tpu.memory_space<vmem>>, vector<8x128xf32>
    %c0_1 = arith.constant 0 : index
    %c0_2 = arith.constant 0 : index
    %1 = vector.load %arg2[%c0_1, %c0_2] : memref<8x128xf32, #tpu.memory_space<vmem>>, vector<8x128xf32>
    %cst = arith.constant 0.000000e+00 : f32
    %2 = vector.broadcast %cst : f32 to vector<8x128xf32>
    %3 = arith.maximumf %0, %2 : vector<8x128xf32>
    %4 = arith.mulf %0, %1 : vector<8x128xf32>
    %5 = arith.subf %3, %4 : vector<8x128xf32>
    %6 = math.absf %0 : vector<8x128xf32>
    %cst_3 = arith.constant 0.000000e+00 : f32
    %7 = vector.broadcast %cst_3 : f32 to vector<8x128xf32>
    %8 = arith.subf %7, %6 : vector<8x128xf32>
    %9 = math.exp %8 : vector<8x128xf32>
    %10 = math.log1p %9 : vector<8x128xf32>
    %11 = arith.addf %5, %10 : vector<8x128xf32>
    %12 = tpu.iota {dimensions = array<i32: 0>} : vector<8x128xi32>
    %13 = tpu.iota {dimensions = array<i32: 1>} : vector<8x128xi32>
    %c8_i32 = arith.constant 8 : i32
    %14 = arith.muli %arg0, %c8_i32 : i32
    %15 = vector.broadcast %14 : i32 to vector<8x128xi32>
    %16 = arith.addi %15, %12 : vector<8x128xi32>
    %c128_i32 = arith.constant 128 : i32
    %17 = vector.broadcast %c128_i32 : i32 to vector<8x128xi32>
    %18 = arith.muli %16, %17 : vector<8x128xi32>
    %19 = arith.addi %18, %13 : vector<8x128xi32>
    %c32_i32 = arith.constant 32 : i32
    %20 = vector.broadcast %c32_i32 : i32 to vector<8x128xi32>
    %21 = arith.cmpi slt, %19, %20 : vector<8x128xi32>
    %cst_4 = arith.constant 0.000000e+00 : f32
    %22 = vector.broadcast %cst_4 : f32 to vector<8x128xf32>
    %23 = arith.select %21, %11, %22 : vector<8x128xi1>, vector<8x128xf32>
    %c0_i32 = arith.constant 0 : i32
    %24 = arith.cmpi eq, %arg0, %c0_i32 : i32
    %25 = arith.extui %24 : i1 to i32
    %c0_i32_5 = arith.constant 0 : i32
    %26 = arith.cmpi ne, %25, %c0_i32_5 : i32
    scf.if %26 {
      %cst_11 = arith.constant 0.000000e+00 : f32
      %35 = vector.broadcast %cst_11 : f32 to vector<1x1xf32>
      %c0_12 = arith.constant 0 : index
      %c0_13 = arith.constant 0 : index
      %36 = vector.load %arg3[%c0_12, %c0_13] : memref<1x1xf32, #tpu.memory_space<vmem>>, vector<1x1xf32>
      tpu.vector_store %arg3[%c0_12, %c0_13], %35 {strides = array<i32>} : memref<1x1xf32, #tpu.memory_space<vmem>>, vector<1x1xf32>,
    } else {
    }
    %c0_6 = arith.constant 0 : index
    %c0_7 = arith.constant 0 : index
    %27 = vector.load %arg3[%c0_6, %c0_7] : memref<1x1xf32, #tpu.memory_space<vmem>>, vector<1x1xf32>
    %28 = vector.shape_cast %23 : vector<8x128xf32> to vector<1x8x128xf32>
    %cst_8 = arith.constant dense<0.000000e+00> : vector<1xf32>
    %29 = vector.multi_reduction <add>, %28, %cst_8 [1, 2] : vector<1x8x128xf32> to vector<1xf32>
    %30 = vector.shape_cast %29 : vector<1xf32> to vector<1x1x1xf32>
    %31 = vector.extract %30[0, 0, 0] : f32 from vector<1x1x1xf32>
    %32 = vector.broadcast %31 : f32 to vector<1x1xf32>
    %33 = arith.addf %27, %32 : vector<1x1xf32>
    %c0_9 = arith.constant 0 : index
    %c0_10 = arith.constant 0 : index
    %34 = vector.load %arg3[%c0_9, %c0_10] : memref<1x1xf32, #tpu.memory_space<vmem>>, vector<1x1xf32>
    tpu.vector_store %arg3[%c0_9, %c0_10], %33 {strides = array<i32>} : memref<1x1xf32, #tpu.memory_space<vmem>>, vector<1x1xf32>,
    return
  }
  func.func @transform_0(%arg0: i32) -> (i32, i32) {
    %c0_i32 = arith.constant 0 : i32
    %c0_i32_0 = arith.constant 0 : i32
    return %arg0, %c0_i32 : i32, i32
  }
  func.func @transform_1(%arg0: i32) -> (i32, i32) {
    %c0_i32 = arith.constant 0 : i32
    %c0_i32_0 = arith.constant 0 : i32
    return %arg0, %c0_i32 : i32, i32
  }
  func.func @transform_2(%arg0: i32) -> (i32, i32) {
    %c0_i32 = arith.constant 0 : i32
    %c0_i32_0 = arith.constant 0 : i32
    %c0_i32_1 = arith.constant 0 : i32
    return %c0_i32, %c0_i32_0 : i32, i32
  }
}

</mosaic_0001>

<bundles_post_ra>
// kernel: tpu_custom_call.1
= control target key start
LH: loop header
LB: loop body
LE: loop exit
PB: predicated region body
PF: predicated region fallthrough
CT: control target
= control target key end

     0   :  { %7 = vsyncpa [#allocation3], 0  ;;  %s241_s0 = inlined_call_operand.hbm [shape: f32[8,128], index: 0, kind: input, shape index: {}]   ;;  %s242_s1 = inlined_call_operand.hbm [shape: f32[8,128], index: 1, kind: input, shape index: {}]   ;;  %s243_s2 = inlined_call_operand.hbm [shape: f32[1,1], index: 2, kind: output, shape index: {}]  }
   0x1   :  { %8 = vsyncpa [#allocation6], 0 }
   0x2   :  { %9 = vsyncpa [#allocation4], 0  ;;  %s184_s9 = smov [#allocation2]   ;;  %s185_s11 = smov [#allocation5]  }
   0x3   :  { %s16_s10 = sshll.u32 %s184_s9, 4  ;;  %s26_s12 = sshll.u32 %s185_s11, 4  ;;  %s17_s10 = int_to_ptr.vmem [resolvable:$true] %s16_s10  ;;  %s27_s12 = int_to_ptr.vmem [resolvable:$true] %s26_s12 }
   0x4   :  { %s112_s15 = scalar_lea.hbm %s241_s0, 128 }
   0x5   :  { %p113_p0 = scmp.ne.s32.totalorder %s241_s0, %s112_s15  ;;  %p116_p1 = scmp.lt.u32.totalorder %s112_s15, %s241_s0 }
   0x7   :  { %p118_p2 = pnand %p116_p1, %p113_p0 }
   0x9   :  { %121 = shalt.err (!%p118_p2)
}
   0xa   :  { %s122_s20 = scalar_lea.vmem %s17_s10, 128  ;;  %p127_p4 = scmp.lt.s32.totalorder %s17_s10, %s17_s10 }
   0xb   :  { %p123_p3 = scmp.ne.s32.totalorder %s17_s10, %s122_s20  ;;  %p128_p5 = scmp.lt.s32.totalorder %s122_s20, %s122_s20 }
   0xd   :  { %p129_p6 = por %p128_p5, %p127_p4 }
   0xf   :  { %p130_p7 = pnand %p129_p6, %p123_p3 }
  0x11   :  { %133 = shalt.err (!%p130_p7)
}
  0x12   :  { %19 = dma.hbm_to_vmem [thread:$0]  %s241_s0, 128, %s17_s10, [#allocation3]  }
  0x13   :  { %s134_s25 = scalar_lea.hbm %s242_s1, 128 }
  0x14   :  { %p135_p8 = scmp.ne.s32.totalorder %s242_s1, %s134_s25  ;;  %p138_p9 = scmp.lt.u32.totalorder %s134_s25, %s242_s1 }
  0x16   :  { %p140_p10 = pnand %p138_p9, %p135_p8 }
  0x18   :  { %143 = shalt.err (!%p140_p10)
}
  0x19   :  { %s144_s30 = scalar_lea.vmem %s27_s12, 128  ;;  %p149_p12 = scmp.lt.s32.totalorder %s27_s12, %s27_s12 }
  0x1a   :  { %p145_p11 = scmp.ne.s32.totalorder %s27_s12, %s144_s30  ;;  %p150_p13 = scmp.lt.s32.totalorder %s144_s30, %s144_s30 }
  0x1c   :  { %p151_p0 = por %p150_p13, %p149_p12 }
  0x1e   :  { %p152_p1 = pnand %p151_p0, %p145_p11 }
  0x20   :  { %155 = shalt.err (!%p152_p1)
}
  0x21   :  { %29 = dma.hbm_to_vmem [thread:$0]  %s242_s1, 128, %s27_s12, [#allocation6]  }
  0x22   :  { %178 = dma.done.wait [#allocation3], 128  }
  0x23   :  { %179 = vsyncadd [#allocation3], 4294967168 }
  0x24   :  { %180 = dma.done.wait [#allocation6], 128  }
  0x25   :  { %181 = vsyncadd [#allocation6], 4294967168  ;;  %vm70_vm0 = vcmask 0   ;;  %v186_v0 = vmov 0.0   ;;  %v36_v1 = vld [vmem:[#allocation2] sm:$0xff]  ;;  %v55_v6 = vlaneseq  ;;  %v37_v10 = vld [vmem:[#allocation5] sm:$0xff] }
  0x26   :  { %71 = vst.msk [vmem:[#allocation7] sm:$0x1] %vm70_vm0, %v186_v0  ;;  %v41_v2 = vand.u32 2147483647, %v36_v1  ;;  %v38_v14 = vmax.f32 %v36_v1, 0.0  ;;  %v39_v15 = vmul.f32 %v37_v10, %v36_v1  ;;  %s187_s1 = smov [#allocation7]  }
  0x27   :  { %v56_v9 = vshrl.u32 %v55_v6, 7  ;;  %v58_v12 = vand.u32 127, %v55_v6  ;;  %s92_s4 = sshll.u32 %s187_s1, 4  ;;  %s93_s4 = int_to_ptr.vmem [resolvable:$true] %s92_s4 }
  0x28   :  { %v42_v3 = vsub.f32 0.0, %v41_v2  ;;  %v40_v20 = vsub.f32 %v38_v14, %v39_v15  ;;  %s156_s6 = scalar_lea.vmem %s93_s4, 16  ;;  %s160_s7 = scalar_lea.vmem %s93_s4, 32 }
  0x29   :  { %v62_v13 = vmul.u32 128, %v56_v9  ;;  %p157_p2 = scmp.ne.s32.totalorder %s93_s4, %s156_s6  ;;  %p161_p3 = scmp.lt.s32.totalorder %s93_s4, %s93_s4 }
  0x2a   :  { %v43_v4 = vmul.f32 1.442695, %v42_v3  ;;  %p162_p4 = scmp.lt.s32.totalorder %s160_s7, %s156_s6 }
  0x2b   :  { %v63_v18 = vadd.s32 %v62_v13, %v58_v12 }
  0x2c   :  { %108 = vpow2.f32 %v43_v4  ;;  %p163_p5 = por %p162_p4, %p161_p3 }
  0x2d   :  { %vm64_vm2 = vcmp.lt.s32.totalorder %v63_v18, 32  ;;  %v72_v32 = vld [vmem:[#allocation7] sm:$0x1] }
  0x2e   :  { %p164_p6 = pnand %p163_p5, %p157_p2 }
  0x36   :  { %v109_v5 = vpop.eup %108 }
  0x37   :  { %v45_v7 = vadd.f32 1.0, %v109_v5  ;;  %v48_v8 = vmul.f32 -0.5, %v109_v5  ;;  %v51_v16 = vand.u32 2147483647, %v109_v5 }
  0x39   :  { %110 = vlog2.f32 %v45_v7  ;;  %v49_v11 = vadd.f32 1.0, %v48_v8  ;;  %vm52_vm1 = vcmp.lt.f32.partialorder %v51_v16, 0.0004427343 }
  0x3b   :  { %v50_v17 = vmul.f32 %v109_v5, %v49_v11 }
  0x43   :  { %v111_v19 = vpop.eup %110 }
  0x44   :  { %v47_v21 = vmul.f32 0.6931472, %v111_v19 }
  0x46   :  { %v53_v22 = vsel %vm52_vm1, %v50_v17, %v47_v21 }
  0x47   :  { %v54_v23 = vadd.f32 %v53_v22, %v40_v20 }
  0x49   :  { %v65_v24 = vsel %vm64_vm2, %v54_v23, 0.0 }
  0x4a   :  { %73 = vadd.xlane.f32.xlu0 %v65_v24 }
  0xd7   :  { %v74_v25 = vpop.xlane.xlu0 %73 }
  0xd8   :  { %v75_v26 = vrot.slane %v74_v25, 4 }
  0xda   :  { %v76_v27 = vadd.f32 %v75_v26, %v74_v25 }
  0xdc   :  { %v77_v28 = vrot.slane %v76_v27, 2 }
  0xde   :  { %v78_v29 = vadd.f32 %v77_v28, %v76_v27 }
  0xe0   :  { %v79_v30 = vrot.slane %v78_v29, 1 }
  0xe2   :  { %v80_v31 = vadd.f32 %v79_v30, %v78_v29 }
  0xe4   :  { %102 = vpush %v80_v31 }
 0x115   :  { %s103_s5 = spop %102 }
 0x116   :  { %v82_v33 = vstv %s103_s5 }
 0x117   :  { %v83_v34 = vadd.f32 %v82_v33, %v72_v32 }
 0x119   :  { %85 = vst.msk [vmem:[#allocation7] sm:$0x1] %vm70_vm0, %v83_v34 }
 0x11a   :  { %167 = shalt.err (!%p164_p6)
}
 0x11b   :  { %s168_s10 = scalar_lea.hbm %s243_s2, 16 }
 0x11c   :  { %p169_p7 = scmp.ne.s32.totalorder %s243_s2, %s168_s10  ;;  %p172_p8 = scmp.lt.u32.totalorder %s168_s10, %s243_s2 }
 0x11e   :  { %p174_p9 = pnand %p172_p8, %p169_p7 }
 0x120   :  { %177 = shalt.err (!%p174_p9)
}
 0x121   :  { %95 = dma.vmem_to_hbm [thread:$0]  %s93_s4, 16, %s243_s2, [#allocation4]  }
 0x122   :  { %182 = dma.done.wait [#allocation4], 16  }
 0x123   :  { %183 = vsyncadd [#allocation4], 4294967280 }
 0x124   :  { %99 = vsyncpa [#allocation3], 1 }
 0x125   :  { %100 = vsyncpa [#allocation6], 1 }
 0x126   :  { %101 = vsyncpa [#allocation4], 1 }

</bundles_post_ra>
